<compile_context>
chip_gen: v7x
topology: tpu7x:2x2x1
jax: 0.10.0
libtpu: 0.0.40
codegen_flags: <defaults>
</compile_context>

<pallas_src>
import functools

import numpy as np
import jax
import jax.numpy as jnp
from jax import lax
from jax.experimental import pallas as pl
from jax.experimental.pallas import tpu as pltpu


def _fused_kernel(mask_ref, w1_ref, b1_ref, w2_ref, b2_ref, w34_ref, b34_ref,
                  w5_ref, w6_ref, b56_ref, x_ref, o_ref, *, W, HW):
    """One batch element of the fused conv / eltwise graph.

    mask_ref : (72, HW) f32   border mask; row k*8+ic corresponds to tap k
    w*_ref   : (Cout, 72) f32 im2col weight matrices (conv3&4 stacked -> 16
               rows; conv5/6 padded to 8 rows);  b*_ref: (Cout, 1) bias cols
    x_ref    : (8, HW) f32    input, channel 0 = image, channels 1..7 = 0
    o_ref    : (1, HW) f32    output plane (flattened spatial, lane dense)
    """
    mask = mask_ref[...]                                    # (72, HW), loaded once

    def conv(act, w_ref, b_ref=None):
        # im2col patch matrix: row k*8+ic = channel ic of `act` shifted by tap
        # k (lane roll -> XLU), zeroed outside the image by the mask.
        blocks = []
        for k in range(9):
            dh, dw = k // 3 - 1, k % 3 - 1
            delta = dh * W + dw
            blocks.append(act if delta == 0
                          else pltpu.roll(act, (-delta) % HW, axis=1))
        p = jnp.concatenate(blocks, axis=0) * mask           # (72, HW)
        r = jnp.dot(w_ref[...], p,                           # MXU, f32
                    preferred_element_type=jnp.float32)
        return r if b_ref is None else r + b_ref[...]        # lane-broadcast bias

    y1 = conv(x_ref[...], w1_ref, b1_ref)         # conv1                (8, HW)
    y = y1 + conv(y1, w2_ref, b2_ref)             # y = y1 + conv2(y1)   (8, HW)
    c34 = conv(y, w34_ref, b34_ref)               # conv3 & conv4 fused  (16, HW)
    x1 = y + c34[0:8, :]                          # y + conv3(y)
    x2 = y + c34[8:16, :]                         # y + conv4(y)
    o5 = conv(x1, w5_ref)                         # conv5 (row 0 valid)
    o6 = conv(x2, w6_ref)                         # conv6 (row 0 valid)
    o_ref[...] = (o5 + o6 + b56_ref[...])[0:1, :]


def eltwise_combination_forward(x, params):
    """x: (N, 1, H, W) f32 NCHW.  Returns (N, 1, H, W) f32."""
    N, C, H, Wd = x.shape
    assert C == 1, "model expects a single input channel"
    HW = H * Wd
    assert HW % 128 == 0, "flattened spatial must fill whole 128-lane vregs"

    (w1, b1), (w2, b2), (w3, b3), (w4, b4), (w5, b5), (w6, b6) = params
    f32 = jnp.float32

    def mat(w):
        # (Cout, Cin, 3, 3) -> (Cout, 9*Cin); column order k*Cin+ic with
        # k = kh*3+kw, matching the patch-matrix row order built in-kernel.
        co, ci = w.shape[0], w.shape[1]
        return jnp.transpose(w.astype(f32), (0, 2, 3, 1)).reshape(co, 9 * ci)

    def pad_rows(m, rows):
        return jnp.concatenate(
            [m, jnp.zeros((rows - m.shape[0], m.shape[1]), f32)], axis=0)

    def col(b, rows=8):
        b = b.reshape(-1, 1).astype(f32)
        return b if b.shape[0] == rows else pad_rows(b, rows)

    # conv1 (1->8): embed its single input channel at ic=0 of an 8-wide slab.
    w1_full = jnp.zeros((8, 8, 3, 3), f32).at[:, 0:1].set(w1.astype(f32))
    w1m, b1c = mat(w1_full), col(b1)                        # (8,72), (8,1)
    w2m, b2c = mat(w2), col(b2)                             # (8,72), (8,1)
    w34m = jnp.concatenate([mat(w3), mat(w4)], axis=0)      # (16,72)  conv3+conv4
    b34c = jnp.concatenate([col(b3), col(b4)], axis=0)      # (16,1)
    w5m = pad_rows(mat(w5), 8)                              # (8,72) rows 1..7 zero
    w6m = pad_rows(mat(w6), 8)                              # (8,72) rows 1..7 zero
    b56c = col(b5) + col(b6)                                # (8,1)

    # Border-validity mask per tap over the flattened spatial axis, repeated
    # for the 8 input channels -> (72, HW).
    hh = np.arange(H)[:, None]
    ww = np.arange(Wd)[None, :]
    rows = []
    for kh in range(3):
        for kw in range(3):
            dh, dw = kh - 1, kw - 1
            valid = ((hh + dh >= 0) & (hh + dh < H) &
                     (ww + dw >= 0) & (ww + dw < Wd))
            rows.append(valid.reshape(-1))
    mask = jnp.asarray(np.repeat(np.stack(rows), 8, axis=0), dtype=f32)   # (72, HW)

    # Input slab: channel 0 = image, channels 1..7 = 0 (keeps every conv on
    # the same sublane-aligned (8, HW) path).
    x8 = jnp.pad(x.astype(f32).reshape(N, 1, HW), ((0, 0), (0, 7), (0, 0)))

    kernel = functools.partial(_fused_kernel, W=Wd, HW=HW)

    consts = (mask, w1m, b1c, w2m, b2c, w34m, b34c, w5m, w6m, b56c)
    const_specs = [pl.BlockSpec(a.shape, lambda n: (0, 0)) for a in consts]

    out = pl.pallas_call(
        kernel,
        out_shape=jax.ShapeDtypeStruct((N, 1, HW), f32),
        grid=(N,),
        in_specs=const_specs + [
            pl.BlockSpec((None, 8, HW), lambda n: (n, 0, 0)),      # x8, 1 elem/step
        ],
        out_specs=pl.BlockSpec((None, 1, HW), lambda n: (n, 0, 0)),  # lane-dense store
        compiler_params=pltpu.CompilerParams(
            dimension_semantics=("parallel",)),     # 2 steps -> both v7x TCs
    )(*consts, x8)

    return out.reshape(N, 1, H, Wd)


def _make_params():
    # create_conv(in, out, k, weight_init, bias_init, padding=1):
    #   weight.fill_(weight_init); weight += eye(k); bias.fill_(bias_init)
    def create_conv(cin, cout, k, wval, bval):
        w = (jnp.full((cout, cin, k, k), float(wval), jnp.float32)
             + jnp.eye(k, dtype=jnp.float32))
        b = jnp.full((cout,), float(bval), jnp.float32)
        return w, b

    return (create_conv(1, 8, 3, 1.0, -2.0),    # conv1
            create_conv(8, 8, 3, 2.0, -2.0),    # conv2
            create_conv(8, 8, 3, 3.0, -2.0),    # conv3
            create_conv(8, 8, 3, 10.0, 0.0),    # conv4
            create_conv(8, 1, 3, -10.0, 0.0),   # conv5
            create_conv(8, 1, 3, -10.0, 0.0))   # conv6


def _reference(x, params):
    dn = ("NCHW", "OIHW", "NCHW")

    def conv(v, wb):
        w, b = wb
        y = lax.conv_general_dilated(v, w, (1, 1), ((1, 1), (1, 1)),
                                     dimension_numbers=dn,
                                     precision=lax.Precision.HIGHEST)
        return y + b[None, :, None, None]

    p1, p2, p3, p4, p5, p6 = params
    y = conv(x, p1)
    y = y + conv(y, p2)
    x1 = y + conv(y, p3)
    x2 = y + conv(y, p4)
    return conv(x1, p5) + conv(x2, p6)


if __name__ == "__main__":
    key = jax.random.PRNGKey(0)
    x = jax.random.normal(key, (2, 1, 16, 16), dtype=jnp.float32)

    params = _make_params()

    out = eltwise_combination_forward(x, params)
    out = jax.block_until_ready(out)

    ref = _reference(x, params)
    assert out.shape == ref.shape == (2, 1, 16, 16)

    # Intermediate magnitudes reach ~1e8 with these test weights, so compare
    # with a scale-aware tolerance (accumulation order differs from XLA conv).
    scale = float(jnp.max(jnp.abs(ref)))
    max_err = float(jnp.max(jnp.abs(out - ref)))
    assert max_err <= 2e-4 * scale + 1e-2, f"mismatch: err={max_err}, scale={scale}"

    print("KERNEL_OK")
</pallas_src>

<mosaic_0001>
module attributes {stable_mosaic.version = 11 : i64} {
  func.func @_fused_kernel(%arg0: i32, %arg1: memref<72x256xf32, #tpu.memory_space<vmem>>, %arg2: memref<8x72xf32, #tpu.memory_space<vmem>>, %arg3: memref<8x1xf32, #tpu.memory_space<vmem>>, %arg4: memref<8x72xf32, #tpu.memory_space<vmem>>, %arg5: memref<8x1xf32, #tpu.memory_space<vmem>>, %arg6: memref<16x72xf32, #tpu.memory_space<vmem>>, %arg7: memref<16x1xf32, #tpu.memory_space<vmem>>, %arg8: memref<8x72xf32, #tpu.memory_space<vmem>>, %arg9: memref<8x72xf32, #tpu.memory_space<vmem>>, %arg10: memref<8x1xf32, #tpu.memory_space<vmem>>, %arg11: memref<1x8x256xf32, #tpu.memory_space<vmem>>, %arg12: memref<1x1x256xf32, #tpu.memory_space<vmem>>) attributes {dimension_semantics = [#tpu.dimension_semantics<parallel>], iteration_bounds = array<i64: 2>, scalar_prefetch = 0 : i64, scratch_operands = 0 : i64, tpu.core_type = #tpu.core_type<tc>, window_params = [{pipeline_mode = #tpu.pipeline_mode<synchronous>, transform_indices = @transform_0, window_bounds = array<i64: 72, 256>}, {pipeline_mode = #tpu.pipeline_mode<synchronous>, transform_indices = @transform_1, window_bounds = array<i64: 8, 72>}, {pipeline_mode = #tpu.pipeline_mode<synchronous>, transform_indices = @transform_2, window_bounds = array<i64: 8, 1>}, {pipeline_mode = #tpu.pipeline_mode<synchronous>, transform_indices = @transform_3, window_bounds = array<i64: 8, 72>}, {pipeline_mode = #tpu.pipeline_mode<synchronous>, transform_indices = @transform_4, window_bounds = array<i64: 8, 1>}, {pipeline_mode = #tpu.pipeline_mode<synchronous>, transform_indices = @transform_5, window_bounds = array<i64: 16, 72>}, {pipeline_mode = #tpu.pipeline_mode<synchronous>, transform_indices = @transform_6, window_bounds = array<i64: 16, 1>}, {pipeline_mode = #tpu.pipeline_mode<synchronous>, transform_indices = @transform_7, window_bounds = array<i64: 8, 72>}, {pipeline_mode = #tpu.pipeline_mode<synchronous>, transform_indices = @transform_8, window_bounds = array<i64: 8, 72>}, {pipeline_mode = #tpu.pipeline_mode<synchronous>, transform_indices = @transform_9, window_bounds = array<i64: 8, 1>}, {transform_indices = @transform_10, window_bounds = array<i64: 1, 8, 256>}, {transform_indices = @transform_11, window_bounds = array<i64: 1, 1, 256>}]} {
    %c0 = arith.constant 0 : index
    %c0_0 = arith.constant 0 : index
    %0 = vector.load %arg1[%c0, %c0_0] : memref<72x256xf32, #tpu.memory_space<vmem>>, vector<72x256xf32>
    %c0_1 = arith.constant 0 : index
    %c0_2 = arith.constant 0 : index
    %c0_3 = arith.constant 0 : index
    %1 = vector.load %arg11[%c0_1, %c0_2, %c0_3] : memref<1x8x256xf32, #tpu.memory_space<vmem>>, vector<1x8x256xf32>
    %2 = vector.shape_cast %1 : vector<1x8x256xf32> to vector<8x256xf32>
    %c17_i32 = arith.constant 17 : i32
    %3 = tpu.dynamic_rotate %2 by %c17_i32 dim 1 : vector<8x256xf32>, i32 -> vector<8x256xf32>
    %c16_i32 = arith.constant 16 : i32
    %4 = tpu.dynamic_rotate %2 by %c16_i32 dim 1 : vector<8x256xf32>, i32 -> vector<8x256xf32>
    %c15_i32 = arith.constant 15 : i32
    %5 = tpu.dynamic_rotate %2 by %c15_i32 dim 1 : vector<8x256xf32>, i32 -> vector<8x256xf32>
    %c1_i32 = arith.constant 1 : i32
    %6 = tpu.dynamic_rotate %2 by %c1_i32 dim 1 : vector<8x256xf32>, i32 -> vector<8x256xf32>
    %c255_i32 = arith.constant 255 : i32
    %7 = tpu.dynamic_rotate %2 by %c255_i32 dim 1 : vector<8x256xf32>, i32 -> vector<8x256xf32>
    %c241_i32 = arith.constant 241 : i32
    %8 = tpu.dynamic_rotate %2 by %c241_i32 dim 1 : vector<8x256xf32>, i32 -> vector<8x256xf32>
    %c240_i32 = arith.constant 240 : i32
    %9 = tpu.dynamic_rotate %2 by %c240_i32 dim 1 : vector<8x256xf32>, i32 -> vector<8x256xf32>
    %c239_i32 = arith.constant 239 : i32
    %10 = tpu.dynamic_rotate %2 by %c239_i32 dim 1 : vector<8x256xf32>, i32 -> vector<8x256xf32>
    %11 = tpu.concatenate %3, %4, %5, %6, %2, %7, %8, %9, %10 in 0 : vector<8x256xf32>, vector<8x256xf32>, vector<8x256xf32>, vector<8x256xf32>, vector<8x256xf32>, vector<8x256xf32>, vector<8x256xf32>, vector<8x256xf32>, vector<8x256xf32> -> vector<72x256xf32>
    %12 = arith.mulf %11, %0 : vector<72x256xf32>
    %c0_4 = arith.constant 0 : index
    %c0_5 = arith.constant 0 : index
    %13 = vector.load %arg2[%c0_4, %c0_5] : memref<8x72xf32, #tpu.memory_space<vmem>>, vector<8x72xf32>
    %cst = arith.constant dense<0.000000e+00> : vector<8x256xf32>
    %14 = tpu.matmul %13, %12, %cst {dimension_numbers = #tpu.dot_dimension_numbers<[1], [0], [0], [1], [0, 0, 1, 1], [], []>} : vector<8x72xf32>, vector<72x256xf32>, vector<8x256xf32> -> vector<8x256xf32>
    %c0_6 = arith.constant 0 : index
    %c0_7 = arith.constant 0 : index
    %15 = vector.load %arg3[%c0_6, %c0_7] : memref<8x1xf32, #tpu.memory_space<vmem>>, vector<8x1xf32>
    %16 = vector.broadcast %15 : vector<8x1xf32> to vector<8x256xf32>
    %17 = arith.addf %14, %16 : vector<8x256xf32>
    %c17_i32_8 = arith.constant 17 : i32
    %18 = tpu.dynamic_rotate %17 by %c17_i32_8 dim 1 : vector<8x256xf32>, i32 -> vector<8x256xf32>
    %c16_i32_9 = arith.constant 16 : i32
    %19 = tpu.dynamic_rotate %17 by %c16_i32_9 dim 1 : vector<8x256xf32>, i32 -> vector<8x256xf32>
    %c15_i32_10 = arith.constant 15 : i32
    %20 = tpu.dynamic_rotate %17 by %c15_i32_10 dim 1 : vector<8x256xf32>, i32 -> vector<8x256xf32>
    %c1_i32_11 = arith.constant 1 : i32
    %21 = tpu.dynamic_rotate %17 by %c1_i32_11 dim 1 : vector<8x256xf32>, i32 -> vector<8x256xf32>
    %c255_i32_12 = arith.constant 255 : i32
    %22 = tpu.dynamic_rotate %17 by %c255_i32_12 dim 1 : vector<8x256xf32>, i32 -> vector<8x256xf32>
    %c241_i32_13 = arith.constant 241 : i32
    %23 = tpu.dynamic_rotate %17 by %c241_i32_13 dim 1 : vector<8x256xf32>, i32 -> vector<8x256xf32>
    %c240_i32_14 = arith.constant 240 : i32
    %24 = tpu.dynamic_rotate %17 by %c240_i32_14 dim 1 : vector<8x256xf32>, i32 -> vector<8x256xf32>
    %c239_i32_15 = arith.constant 239 : i32
    %25 = tpu.dynamic_rotate %17 by %c239_i32_15 dim 1 : vector<8x256xf32>, i32 -> vector<8x256xf32>
    %26 = tpu.concatenate %18, %19, %20, %21, %17, %22, %23, %24, %25 in 0 : vector<8x256xf32>, vector<8x256xf32>, vector<8x256xf32>, vector<8x256xf32>, vector<8x256xf32>, vector<8x256xf32>, vector<8x256xf32>, vector<8x256xf32>, vector<8x256xf32> -> vector<72x256xf32>
    %27 = arith.mulf %26, %0 : vector<72x256xf32>
    %c0_16 = arith.constant 0 : index
    %c0_17 = arith.constant 0 : index
    %28 = vector.load %arg4[%c0_16, %c0_17] : memref<8x72xf32, #tpu.memory_space<vmem>>, vector<8x72xf32>
    %cst_18 = arith.constant dense<0.000000e+00> : vector<8x256xf32>
    %29 = tpu.matmul %28, %27, %cst_18 {dimension_numbers = #tpu.dot_dimension_numbers<[1], [0], [0], [1], [0, 0, 1, 1], [], []>} : vector<8x72xf32>, vector<72x256xf32>, vector<8x256xf32> -> vector<8x256xf32>
    %c0_19 = arith.constant 0 : index
    %c0_20 = arith.constant 0 : index
    %30 = vector.load %arg5[%c0_19, %c0_20] : memref<8x1xf32, #tpu.memory_space<vmem>>, vector<8x1xf32>
    %31 = vector.broadcast %30 : vector<8x1xf32> to vector<8x256xf32>
    %32 = arith.addf %29, %31 : vector<8x256xf32>
    %33 = arith.addf %17, %32 : vector<8x256xf32>
    %c17_i32_21 = arith.constant 17 : i32
    %34 = tpu.dynamic_rotate %33 by %c17_i32_21 dim 1 : vector<8x256xf32>, i32 -> vector<8x256xf32>
    %c16_i32_22 = arith.constant 16 : i32
    %35 = tpu.dynamic_rotate %33 by %c16_i32_22 dim 1 : vector<8x256xf32>, i32 -> vector<8x256xf32>
    %c15_i32_23 = arith.constant 15 : i32
    %36 = tpu.dynamic_rotate %33 by %c15_i32_23 dim 1 : vector<8x256xf32>, i32 -> vector<8x256xf32>
    %c1_i32_24 = arith.constant 1 : i32
    %37 = tpu.dynamic_rotate %33 by %c1_i32_24 dim 1 : vector<8x256xf32>, i32 -> vector<8x256xf32>
    %c255_i32_25 = arith.constant 255 : i32
    %38 = tpu.dynamic_rotate %33 by %c255_i32_25 dim 1 : vector<8x256xf32>, i32 -> vector<8x256xf32>
    %c241_i32_26 = arith.constant 241 : i32
    %39 = tpu.dynamic_rotate %33 by %c241_i32_26 dim 1 : vector<8x256xf32>, i32 -> vector<8x256xf32>
    %c240_i32_27 = arith.constant 240 : i32
    %40 = tpu.dynamic_rotate %33 by %c240_i32_27 dim 1 : vector<8x256xf32>, i32 -> vector<8x256xf32>
    %c239_i32_28 = arith.constant 239 : i32
    %41 = tpu.dynamic_rotate %33 by %c239_i32_28 dim 1 : vector<8x256xf32>, i32 -> vector<8x256xf32>
    %42 = tpu.concatenate %34, %35, %36, %37, %33, %38, %39, %40, %41 in 0 : vector<8x256xf32>, vector<8x256xf32>, vector<8x256xf32>, vector<8x256xf32>, vector<8x256xf32>, vector<8x256xf32>, vector<8x256xf32>, vector<8x256xf32>, vector<8x256xf32> -> vector<72x256xf32>
    %43 = arith.mulf %42, %0 : vector<72x256xf32>
    %c0_29 = arith.constant 0 : index
    %c0_30 = arith.constant 0 : index
    %44 = vector.load %arg6[%c0_29, %c0_30] : memref<16x72xf32, #tpu.memory_space<vmem>>, vector<16x72xf32>
    %cst_31 = arith.constant dense<0.000000e+00> : vector<16x256xf32>
    %45 = tpu.matmul %44, %43, %cst_31 {dimension_numbers = #tpu.dot_dimension_numbers<[1], [0], [0], [1], [0, 0, 1, 1], [], []>} : vector<16x72xf32>, vector<72x256xf32>, vector<16x256xf32> -> vector<16x256xf32>
    %c0_32 = arith.constant 0 : index
    %c0_33 = arith.constant 0 : index
    %46 = vector.load %arg7[%c0_32, %c0_33] : memref<16x1xf32, #tpu.memory_space<vmem>>, vector<16x1xf32>
    %47 = vector.broadcast %46 : vector<16x1xf32> to vector<16x256xf32>
    %48 = arith.addf %45, %47 : vector<16x256xf32>
    %49 = vector.extract_strided_slice %48 {offsets = [0, 0], sizes = [8, 256], strides = [1, 1]} : vector<16x256xf32> to vector<8x256xf32>
    %50 = arith.addf %33, %49 : vector<8x256xf32>
    %51 = vector.extract_strided_slice %48 {offsets = [8, 0], sizes = [8, 256], strides = [1, 1]} : vector<16x256xf32> to vector<8x256xf32>
    %52 = arith.addf %33, %51 : vector<8x256xf32>
    %c17_i32_34 = arith.constant 17 : i32
    %53 = tpu.dynamic_rotate %50 by %c17_i32_34 dim 1 : vector<8x256xf32>, i32 -> vector<8x256xf32>
    %c16_i32_35 = arith.constant 16 : i32
    %54 = tpu.dynamic_rotate %50 by %c16_i32_35 dim 1 : vector<8x256xf32>, i32 -> vector<8x256xf32>
    %c15_i32_36 = arith.constant 15 : i32
    %55 = tpu.dynamic_rotate %50 by %c15_i32_36 dim 1 : vector<8x256xf32>, i32 -> vector<8x256xf32>
    %c1_i32_37 = arith.constant 1 : i32
    %56 = tpu.dynamic_rotate %50 by %c1_i32_37 dim 1 : vector<8x256xf32>, i32 -> vector<8x256xf32>
    %c255_i32_38 = arith.constant 255 : i32
    %57 = tpu.dynamic_rotate %50 by %c255_i32_38 dim 1 : vector<8x256xf32>, i32 -> vector<8x256xf32>
    %c241_i32_39 = arith.constant 241 : i32
    %58 = tpu.dynamic_rotate %50 by %c241_i32_39 dim 1 : vector<8x256xf32>, i32 -> vector<8x256xf32>
    %c240_i32_40 = arith.constant 240 : i32
    %59 = tpu.dynamic_rotate %50 by %c240_i32_40 dim 1 : vector<8x256xf32>, i32 -> vector<8x256xf32>
    %c239_i32_41 = arith.constant 239 : i32
    %60 = tpu.dynamic_rotate %50 by %c239_i32_41 dim 1 : vector<8x256xf32>, i32 -> vector<8x256xf32>
    %61 = tpu.concatenate %53, %54, %55, %56, %50, %57, %58, %59, %60 in 0 : vector<8x256xf32>, vector<8x256xf32>, vector<8x256xf32>, vector<8x256xf32>, vector<8x256xf32>, vector<8x256xf32>, vector<8x256xf32>, vector<8x256xf32>, vector<8x256xf32> -> vector<72x256xf32>
    %62 = arith.mulf %61, %0 : vector<72x256xf32>
    %c0_42 = arith.constant 0 : index
    %c0_43 = arith.constant 0 : index
    %63 = vector.load %arg8[%c0_42, %c0_43] : memref<8x72xf32, #tpu.memory_space<vmem>>, vector<8x72xf32>
    %cst_44 = arith.constant dense<0.000000e+00> : vector<8x256xf32>
    %64 = tpu.matmul %63, %62, %cst_44 {dimension_numbers = #tpu.dot_dimension_numbers<[1], [0], [0], [1], [0, 0, 1, 1], [], []>} : vector<8x72xf32>, vector<72x256xf32>, vector<8x256xf32> -> vector<8x256xf32>
    %c17_i32_45 = arith.constant 17 : i32
    %65 = tpu.dynamic_rotate %52 by %c17_i32_45 dim 1 : vector<8x256xf32>, i32 -> vector<8x256xf32>
    %c16_i32_46 = arith.constant 16 : i32
    %66 = tpu.dynamic_rotate %52 by %c16_i32_46 dim 1 : vector<8x256xf32>, i32 -> vector<8x256xf32>
    %c15_i32_47 = arith.constant 15 : i32
    %67 = tpu.dynamic_rotate %52 by %c15_i32_47 dim 1 : vector<8x256xf32>, i32 -> vector<8x256xf32>
    %c1_i32_48 = arith.constant 1 : i32
    %68 = tpu.dynamic_rotate %52 by %c1_i32_48 dim 1 : vector<8x256xf32>, i32 -> vector<8x256xf32>
    %c255_i32_49 = arith.constant 255 : i32
    %69 = tpu.dynamic_rotate %52 by %c255_i32_49 dim 1 : vector<8x256xf32>, i32 -> vector<8x256xf32>
    %c241_i32_50 = arith.constant 241 : i32
    %70 = tpu.dynamic_rotate %52 by %c241_i32_50 dim 1 : vector<8x256xf32>, i32 -> vector<8x256xf32>
    %c240_i32_51 = arith.constant 240 : i32
    %71 = tpu.dynamic_rotate %52 by %c240_i32_51 dim 1 : vector<8x256xf32>, i32 -> vector<8x256xf32>
    %c239_i32_52 = arith.constant 239 : i32
    %72 = tpu.dynamic_rotate %52 by %c239_i32_52 dim 1 : vector<8x256xf32>, i32 -> vector<8x256xf32>
    %73 = tpu.concatenate %65, %66, %67, %68, %52, %69, %70, %71, %72 in 0 : vector<8x256xf32>, vector<8x256xf32>, vector<8x256xf32>, vector<8x256xf32>, vector<8x256xf32>, vector<8x256xf32>, vector<8x256xf32>, vector<8x256xf32>, vector<8x256xf32> -> vector<72x256xf32>
    %74 = arith.mulf %73, %0 : vector<72x256xf32>
    %c0_53 = arith.constant 0 : index
    %c0_54 = arith.constant 0 : index
    %75 = vector.load %arg9[%c0_53, %c0_54] : memref<8x72xf32, #tpu.memory_space<vmem>>, vector<8x72xf32>
    %cst_55 = arith.constant dense<0.000000e+00> : vector<8x256xf32>
    %76 = tpu.matmul %75, %74, %cst_55 {dimension_numbers = #tpu.dot_dimension_numbers<[1], [0], [0], [1], [0, 0, 1, 1], [], []>} : vector<8x72xf32>, vector<72x256xf32>, vector<8x256xf32> -> vector<8x256xf32>
    %77 = arith.addf %64, %76 : vector<8x256xf32>
    %c0_56 = arith.constant 0 : index
    %c0_57 = arith.constant 0 : index
    %78 = vector.load %arg10[%c0_56, %c0_57] : memref<8x1xf32, #tpu.memory_space<vmem>>, vector<8x1xf32>
    %79 = vector.broadcast %78 : vector<8x1xf32> to vector<8x256xf32>
    %80 = arith.addf %77, %79 : vector<8x256xf32>
    %81 = vector.extract_strided_slice %80 {offsets = [0, 0], sizes = [1, 256], strides = [1, 1]} : vector<8x256xf32> to vector<1x256xf32>
    %c0_58 = arith.constant 0 : index
    %c0_59 = arith.constant 0 : index
    %c0_60 = arith.constant 0 : index
    %82 = vector.load %arg12[%c0_58, %c0_59, %c0_60] : memref<1x1x256xf32, #tpu.memory_space<vmem>>, vector<1x1x256xf32>
    %83 = vector.shape_cast %82 : vector<1x1x256xf32> to vector<1x256xf32>
    %84 = vector.shape_cast %81 : vector<1x256xf32> to vector<1x1x256xf32>
    tpu.vector_store %arg12[%c0_58, %c0_59, %c0_60], %84 {strides = array<i32>} : memref<1x1x256xf32, #tpu.memory_space<vmem>>, vector<1x1x256xf32>,
    return
  }
  func.func @transform_0(%arg0: i32) -> (i32, i32) {
    %c0_i32 = arith.constant 0 : i32
    %c0_i32_0 = arith.constant 0 : i32
    %c0_i32_1 = arith.constant 0 : i32
    return %c0_i32, %c0_i32_0 : i32, i32
  }
  func.func @transform_1(%arg0: i32) -> (i32, i32) {
    %c0_i32 = arith.constant 0 : i32
    %c0_i32_0 = arith.constant 0 : i32
    %c0_i32_1 = arith.constant 0 : i32
    return %c0_i32, %c0_i32_0 : i32, i32
  }
  func.func @transform_2(%arg0: i32) -> (i32, i32) {
    %c0_i32 = arith.constant 0 : i32
    %c0_i32_0 = arith.constant 0 : i32
    %c0_i32_1 = arith.constant 0 : i32
    return %c0_i32, %c0_i32_0 : i32, i32
  }
  func.func @transform_3(%arg0: i32) -> (i32, i32) {
    %c0_i32 = arith.constant 0 : i32
    %c0_i32_0 = arith.constant 0 : i32
    %c0_i32_1 = arith.constant 0 : i32
    return %c0_i32, %c0_i32_0 : i32, i32
  }
  func.func @transform_4(%arg0: i32) -> (i32, i32) {
    %c0_i32 = arith.constant 0 : i32
    %c0_i32_0 = arith.constant 0 : i32
    %c0_i32_1 = arith.constant 0 : i32
    return %c0_i32, %c0_i32_0 : i32, i32
  }
  func.func @transform_5(%arg0: i32) -> (i32, i32) {
    %c0_i32 = arith.constant 0 : i32
    %c0_i32_0 = arith.constant 0 : i32
    %c0_i32_1 = arith.constant 0 : i32
    return %c0_i32, %c0_i32_0 : i32, i32
  }
  func.func @transform_6(%arg0: i32) -> (i32, i32) {
    %c0_i32 = arith.constant 0 : i32
    %c0_i32_0 = arith.constant 0 : i32
    %c0_i32_1 = arith.constant 0 : i32
    return %c0_i32, %c0_i32_0 : i32, i32
  }
  func.func @transform_7(%arg0: i32) -> (i32, i32) {
    %c0_i32 = arith.constant 0 : i32
    %c0_i32_0 = arith.constant 0 : i32
    %c0_i32_1 = arith.constant 0 : i32
    return %c0_i32, %c0_i32_0 : i32, i32
  }
  func.func @transform_8(%arg0: i32) -> (i32, i32) {
    %c0_i32 = arith.constant 0 : i32
    %c0_i32_0 = arith.constant 0 : i32
    %c0_i32_1 = arith.constant 0 : i32
    return %c0_i32, %c0_i32_0 : i32, i32
  }
  func.func @transform_9(%arg0: i32) -> (i32, i32) {
    %c0_i32 = arith.constant 0 : i32
    %c0_i32_0 = arith.constant 0 : i32
    %c0_i32_1 = arith.constant 0 : i32
    return %c0_i32, %c0_i32_0 : i32, i32
  }
  func.func @transform_10(%arg0: i32) -> (i32, i32, i32) {
    %c0_i32 = arith.constant 0 : i32
    %c0_i32_0 = arith.constant 0 : i32
    %c0_i32_1 = arith.constant 0 : i32
    return %arg0, %c0_i32, %c0_i32_0 : i32, i32, i32
  }
  func.func @transform_11(%arg0: i32) -> (i32, i32, i32) {
    %c0_i32 = arith.constant 0 : i32
    %c0_i32_0 = arith.constant 0 : i32
    %c0_i32_1 = arith.constant 0 : i32
    return %arg0, %c0_i32, %c0_i32_0 : i32, i32, i32
  }
}

</mosaic_0001>

<bundles_post_ra>
// kernel: tpu_custom_call.1
= control target key start
LH: loop header
LB: loop body
LE: loop exit
PB: predicated region body
PF: predicated region fallthrough
CT: control target
= control target key end

     0   :  { %16 = vsyncpa [#allocation3], 0  ;;  %s2434_s0 = inlined_call_operand.hbm [shape: f32[72,256], index: 0, kind: input, shape index: {}]   ;;  %s2435_s1 = inlined_call_operand.vmem [shape: f32[8,72], index: 1, kind: input, shape index: {}]   ;;  %s2436_s2 = inlined_call_operand.vmem [shape: f32[8,1], index: 2, kind: input, shape index: {}]   ;;  %s2437_s3 = inlined_call_operand.hbm [shape: f32[8,72], index: 3, kind: input, shape index: {}]   ;;  %s2438_s4 = inlined_call_operand.vmem [shape: f32[8,1], index: 4, kind: input, shape index: {}]   ;;  %s2439_s5 = inlined_call_operand.vmem [shape: f32[16,72], index: 5, kind: input, shape index: {}]   ;;  %s2440_s6 = inlined_call_operand.vmem [shape: f32[16,1], index: 6, kind: input, shape index: {}]   ;;  %s2441_s7 = inlined_call_operand.vmem [shape: f32[8,72], index: 7, kind: input, shape index: {}]   ;;  %s2442_s8 = inlined_call_operand.vmem [shape: f32[8,72], index: 8, kind: input, shape index: {}]   ;;  %s2443_s9 = inlined_call_operand.vmem [shape: f32[8,1], index: 9, kind: input, shape index: {}]   ;;  %s2444_s10 = inlined_call_operand.vmem [shape: f32[2,8,256], index: 10, kind: input, shape index: {}]   ;;  %s2445_s11 = inlined_call_operand.hbm [shape: f32[2,1,256], index: 11, kind: output, shape index: {}]  }
   0x1   :  { %17 = vsyncpa [#allocation6], 0 }
   0x2   :  { %18 = vsyncpa [#allocation4], 0 }
   0x3   :  { %20 = vsyncpa [#allocation4 + $0x1], 0  ;;  %s1701_s17 = smov 0   ;;  %s1703_s18 = smov 0  }
   0x4   :  { %s1705_s19 = smov 0   ;;  %s1707_s20 = smov 0  }
   0x5 LB: > { %2454 = sst [smem:[#allocation11_spill]] %s1611_s17  ;;  %s1722_s21 = sadd.s32 4294967295, %s1623_s20   ;;  %s1623_s20 = sphi %s1707_s20, %s2472_s20   ;;  %s1619_s19 = sphi %s1705_s19, %s2474_s19   ;;  %s1615_s18 = sphi %s1703_s18, %s2476_s18   ;;  %s1611_s17 = sphi %s1701_s17, %s2475_s17  }
   0x6   : > { %2455 = sst [smem:[#allocation12_spill]] %s1619_s19  ;;  %s1316_s22 = sadd.s32 4294967294, %s1623_s20  }
   0x7   : > { %s1726_s23 = sadd.s32 1, %s1623_s20   ;;  %s269_s24 = sadd.s32 1, %s1619_s19 }
   0x8   : > { %2456 = sst [smem:[#allocation13_spill]] %s1726_s23  ;;  %s266_s25 = ssub.s32 %s1623_s20, %s1726_s23 }
   0x9   : > { %p279_p0 = scmp.ne.s32.totalorder %s1619_s19, %s1615_s18  ;;  %p267_p1 = scmp.eq.s32.totalorder %s266_s25, 0 }
   0xa   : > { %p280_p2 = scmp.eq.s32.totalorder %s1722_s21, 1  ;;  %p285_p3 = scmp.ne.s32.totalorder %s1615_s18, %s1611_s17 }
   0xb   : > { %p286_p4 = scmp.eq.s32.totalorder %s1316_s22, 1  ;;  %p1317_p7 = scmp.ge.s32.totalorder %s1623_s20, 1 }
   0xc   : > { %s1737_s26 = scalar_select %p267_p1, %s1619_s19, %s269_s24  }
   0xd   : > { %p1739_p5 = por %p280_p2, %p279_p0  ;;  %p1743_p6 = por %p286_p4, %p285_p3 }
   0xe   : > { %2457 = sst [smem:[#allocation14_spill]] %s1737_s26  ;;  %p293_p8 = scmp.lt.s32.totalorder %s1623_s20, 3 }
   0xf   : > { %s2458_s27 = scalar_select %p1739_p5, 1, 0 }
  0x10   : > { %s2459_s28 = scalar_select %p1743_p6, 1, 0 }
  0x11   : > { %p2447_p9 = scmp.eq.s32.totalorder %s1722_s21, 0  ;;  %p1750_p10 = pnand %p1317_p7, %p293_p8 }
  0x12   : > { %2460 = sst [smem:[#allocation15_spill]] %s2459_s28  ;;  %s1625_s30 = smov [#allocation2]  }
  0x13   : > { %s2461_s29 = scalar_select %p1750_p10, 1, 0 }
  0x14   : > { %s305_s12 = sshll.u32 %s1625_s30, 4  ;;  %p1432_p11 = pneg %p1750_p10  ;;  %s306_s12 = int_to_ptr.vmem [resolvable:$true] %s305_s12 }
  0x15   : > { %s1626_s14 = smov [#allocation5]   ;;  %s1497_s24 = scalar_lea.hbm %s2434_s0, 2304 }
  0x16   : > { %p1758_p12 = pnand %p2447_p9, %p1432_p11  ;;  %s325_s15 = sshll.u32 %s1626_s14, 4  ;;  %s1762_s15 = int_to_ptr.vmem [resolvable:$true] %s325_s15 }
  0x17   : > { %p1498_p13 = scmp.ne.s32.totalorder %s2434_s0, %s1497_s24  ;;  %p1504_p3 = scmp.lt.u32.totalorder %s1497_s24, %s2434_s0 }
  0x18   : > { %p1499_p0 = pneg %p1758_p12 }
  0x1a   : > { %p1500_p1 = pnand %p1499_p0, %p1498_p13 }
  0x1c   : > { %p1501_p2 = pneg %p1500_p1 }
  0x1e   : > { %p1506_p4 = pnand %p1504_p3, %p1501_p2 }
  0x20   : > { %1509 = shalt.err (!%p1506_p4)
}
  0x21   : > { %s1510_s14 = scalar_lea.vmem %s306_s12, 2304  ;;  %p1518_p9 = scmp.lt.s32.totalorder %s306_s12, %s306_s12 }
  0x22   : > { %p1511_p7 = scmp.ne.s32.totalorder %s306_s12, %s1510_s14  ;;  %p1519_p6 = scmp.lt.s32.totalorder %s1510_s14, %s1510_s14 }
  0x24   : > { %p1513_p8 = pnand %p1511_p7, %p1499_p0  ;;  %p1520_p5 = por %p1519_p6, %p1518_p9 }
  0x26   : > { %p1514_p11 = pneg %p1513_p8 }
  0x28   : > { %p1521_p10 = pnand %p1520_p5, %p1514_p11 }
  0x2a   : > { %1524 = shalt.err (!%p1521_p10)
}
  0x2b   : > { %s1627_s16 = smov 256   ;;  %s1628_s22 = smov 16  }
  0x2c   : > { %1435 = dma.hbm_to_vmem [thread:$0]  (!%p1758_p12), %s2434_s0, 2304, %s306_s12, [#allocation3], %s1627_s16, %s1627_s16, %s1628_s22  }
  0x2d   : > { %s1525_s30 = scalar_lea.hbm %s2437_s3, 128 }
  0x2e   : > { %p1526_p13 = scmp.ne.s32.totalorder %s2437_s3, %s1525_s30  ;;  %p1532_p9 = scmp.lt.u32.totalorder %s1525_s30, %s2437_s3 }
  0x30   : > { %p1528_p5 = pnand %p1526_p13, %p1499_p0 }
  0x32   : > { %p1529_p6 = pneg %p1528_p5 }
  0x34   : > { %p1534_p10 = pnand %p1532_p9, %p1529_p6 }
  0x36   : > { %1537 = shalt.err (!%p1534_p10)
}
  0x37   : > { %s1538_s12 = scalar_lea.vmem %s1762_s15, 128  ;;  %p1546_p4 = scmp.lt.s32.totalorder %s1762_s15, %s1762_s15 }
  0x38   : > { %p1539_p1 = scmp.ne.s32.totalorder %s1762_s15, %s1538_s12  ;;  %p1547_p7 = scmp.lt.s32.totalorder %s1538_s12, %s1538_s12 }
  0x3a   : > { %p1541_p2 = pnand %p1539_p1, %p1499_p0  ;;  %p1548_p8 = por %p1547_p7, %p1546_p4 }
  0x3c   : > { %p1542_p3 = pneg %p1541_p2 }
  0x3e   : > { %p1549_p11 = pnand %p1548_p8, %p1542_p3 }
  0x40   : > { %1552 = shalt.err (!%p1549_p11)
}
  0x41   : > { %1438 = dma.hbm_to_vmem [thread:$0]  (!%p1758_p12), %s2437_s3, 128, %s1762_s15, [#allocation6]  }
  0x42   : > { %p2463_p13 = scmp.ne.s32.totalorder %s2461_s29, 0 }
  0x43   : > { %p2464_p5 = scmp.eq.s32.totalorder (!%p2463_p13), %s1722_s21, 0 }
  0x44   : > { %364 = sbr.rel (%p2463_p13) target bundleno = 1606 (0x646), region = 64 }
  0x4b   : > { %1598 = dma.done.wait (%p2464_p5), [#allocation3], 2304   ;;  %p2465_p0 = pmov %p2464_p5 }
  0x4d   : > { %1600 = vsyncadd (%p2465_p0), [#allocation3], 4294964992  ;;  %p2466_p6 = pmov %p2465_p0 }
  0x4e   : > { %p2467_p9 = pmov %p2465_p0 }
  0x4f   : > { %1602 = dma.done.wait (%p2466_p6), [#allocation6], 128  }
  0x50   : > { %1604 = vsyncadd (%p2467_p9), [#allocation6], 4294967168  ;;  %p408_p10 = scmp.lt.s32.totalorder %s1722_s21, 1  ;;  %s1629_s22 = smov 16   ;;  %v1635_v2 = vmov 0.0   ;;  %v1636_v3 = vmov 0   ;;  %v437_v5 = vlaneseq }
  0x51   : > { %s1630_s19 = smov 17   ;;  %s1631_s26 = smov 15   ;;  %584 = vmatprep.mubr.f32.mxu0 %v1635_v2  ;;  %731 = vmatprep.mubr.f32.mxu1 %v1635_v2  ;;  %v510_v4 = vld [vmem:[%s2436_s2] sm:$0xff]  ;;  %v1871_v9 = vld [vmem:[#allocation2 + $0x10] sm:$0xff]  ;;  %v1876_v11 = vld [vmem:[#allocation2 + $0x8] sm:$0xff]  ;;  %vm516_vm8 = vcmask 588800  }
  0x52   : > { %s409_s28 = scalar_select %p408_p10, %s1722_s21, 1  ;;  %1495 = vset.pattern.permute.xlu0 %v1636_v3  ;;  %1496 = vset.pattern.permute.xlu1 %v1636_v3  ;;  %v1868_v6 = vand.u32 127, %v437_v5  ;;  %v1874_v10 = vld [vmem:[#allocation2] sm:$0xff]  ;;  %v1878_v12 = vld [vmem:[#allocation2 + $0x18] sm:$0xff]  ;;  %v1896_v28 = vld [vmem:[#allocation2 + $0x28] sm:$0xff]  ;;  %vm1217_vm9 = vcmp.lt.s32.totalorder %v437_v5, 256 }
  0x53   : > { %s1632_s24 = smov 1   ;;  %s1633_s25 = smov 127   ;;  %v1893_v27 = vld [vmem:[#allocation2 + $0x20] sm:$0xff]  ;;  %v1902_v31 = vld [vmem:[#allocation2 + $0x30] sm:$0xff]  ;;  %v1904_v32 = vld [vmem:[#allocation2 + $0x38] sm:$0xff] }
  0x54   : > { %s1338_s13 = sshll.u32 %s409_s28, 4  ;;  %s1634_s30 = smov 113   ;;  %vm446_vm0 = vcmp.lt.s32.totalorder %v1868_v6, 16  ;;  %vm439_vm1 = vcmp.lt.s32.totalorder %v1868_v6, 17  ;;  %vm453_vm2 = vcmp.lt.s32.totalorder %v1868_v6, 15  ;;  %vm460_vm3 = vcmp.lt.s32.totalorder %v1868_v6, 1 }
  0x55   : > { %s412_s16 = scalar_lea.vmem %s2444_s10, %s1338_s13  ;;  %s1637_s14 = smov 112   ;;  %vm467_vm4 = vcmp.lt.s32.totalorder %v1868_v6, 127  ;;  %v1911_v37 = vld [vmem:[#allocation2 + $0x48] sm:$0xff]  ;;  %v1913_v38 = vld [vmem:[#allocation2 + $0x40] sm:$0xff]  ;;  %v1919_v43 = vld [vmem:[#allocation2 + $0x50] sm:$0xff]  ;;  %vm474_vm5 = vcmp.lt.s32.totalorder %v1868_v6, 113 }
  0x56   : > { %v1826_v0 = vld [vmem:[%s412_s16] sm:$0xff]  ;;  %v1832_v1 = vld [vmem:[%s412_s16 + $0x8] sm:$0xff]  ;;  %s1638_s12 = smov 111   ;;  %v1921_v44 = vld [vmem:[#allocation2 + $0x58] sm:$0xff]  ;;  %vm481_vm6 = vcmp.lt.s32.totalorder %v1868_v6, 112  ;;  %vm488_vm7 = vcmp.lt.s32.totalorder %v1868_v6, 111 }
  0x57   : > { %442 = vrot.lane.b32.xlu1 %v1826_v0, %s1629_s22  ;;  %433 = vrot.lane.b32.xlu0 %v1826_v0, %s1630_s19  ;;  %v500_v49 = vmul.f32 %v1832_v1, %v1911_v37  ;;  %v499_v50 = vmul.f32 %v1826_v0, %v1913_v38  ;;  %v1934_v59 = vld [vmem:[#allocation2 + $0x60] sm:$0xff]  ;;  %v1937_v60 = vld [vmem:[#allocation2 + $0x68] sm:$0xff]  ;;  %v1943_v63 = vld [vmem:[#allocation2 + $0x70] sm:$0xff]  ;;  %s1339_s17 = sshll.u32 %s1722_s21, 5  ;;  %p2468_p1 = scmp.ne.s32.totalorder %s2458_s27, 0 }
  0x58   : > { %s2392_s29 = scalar_lea.hbm %s2445_s11, %s1339_s17  ;;  %s1640_s21 = smov [#allocation7]  }
  0x5b   : > { %444 = vrot.lane.b32.xlu1 %v1832_v1, %s1629_s22  ;;  %435 = vrot.lane.b32.xlu0 %v1832_v1, %s1630_s19 }
  0x5f   : > { %451 = vrot.lane.b32.xlu1 %v1832_v1, %s1631_s26  ;;  %449 = vrot.lane.b32.xlu0 %v1826_v0, %s1631_s26 }
  0x63   : > { %458 = vrot.lane.b32.xlu1 %v1832_v1, %s1632_s24  ;;  %456 = vrot.lane.b32.xlu0 %v1826_v0, %s1632_s24 }
  0x67   : > { %465 = vrot.lane.b32.xlu1 %v1832_v1, %s1633_s25  ;;  %463 = vrot.lane.b32.xlu0 %v1826_v0, %s1633_s25 }
  0x6b   : > { %472 = vrot.lane.b32.xlu1 %v1832_v1, %s1634_s30  ;;  %470 = vrot.lane.b32.xlu0 %v1826_v0, %s1634_s30 }
  0x6f   : > { %479 = vrot.lane.b32.xlu1 %v1832_v1, %s1637_s14  ;;  %477 = vrot.lane.b32.xlu0 %v1826_v0, %s1637_s14 }
  0x73   : > { %486 = vrot.lane.b32.xlu1 %v1832_v1, %s1638_s12  ;;  %484 = vrot.lane.b32.xlu0 %v1826_v0, %s1638_s12  ;;  %v1945_v0 = vld [vmem:[#allocation2 + $0x78] sm:$0xff] }
  0x77   : > { %513 = vperm.xlu0 %1495, %v510_v4  }
  0xc9   : > { %v443_v7 = vpop.permute.xlu1 %442  ;;  %v434_v8 = vpop.permute.xlu0 %433 }
  0xcd   : > { %v445_v13 = vpop.permute.xlu1 %444  ;;  %v436_v14 = vpop.permute.xlu0 %435 }
  0xce   : > { %v447_v15 = vsel %vm446_vm0, %v443_v7, %v445_v13  ;;  %v448_v16 = vsel %vm446_vm0, %v445_v13, %v443_v7  ;;  %v440_v17 = vsel %vm439_vm1, %v434_v8, %v436_v14  ;;  %v441_v18 = vsel %vm439_vm1, %v436_v14, %v434_v8 }
  0xcf   : > { %v493_v19 = vmul.f32 %v448_v16, %v1871_v9  ;;  %v491_v20 = vmul.f32 %v441_v18, %v1874_v10  ;;  %v492_v21 = vmul.f32 %v440_v17, %v1876_v11  ;;  %v494_v22 = vmul.f32 %v447_v15, %v1878_v12  ;;  %v1956_v16 = vld [vmem:[#allocation2 + $0x88] sm:$0xff] }
  0xd1   : > { %v452_v23 = vpop.permute.xlu1 %451  ;;  %v450_v24 = vpop.permute.xlu0 %449  ;;  %v1340_v25 = vpack.c.bf16 %v494_v22, %v492_v21  ;;  %v1342_v26 = vpack.c.bf16 %v493_v19, %v491_v20  ;;  %v1958_v19 = vld [vmem:[#allocation2 + $0x80] sm:$0xff] }
  0xd2   : > { %v454_v29 = vsel %vm453_vm2, %v450_v24, %v452_v23  ;;  %v455_v30 = vsel %vm453_vm2, %v452_v23, %v450_v24 }
  0xd3   : > { %1341 = vmatprep.subr.bf16.mxu0 %v1340_v25  ;;  %v495_v39 = vmul.f32 %v455_v30, %v1893_v27  ;;  %v496_v40 = vmul.f32 %v454_v29, %v1896_v28 }
  0xd4   : > { %1343 = vmatpush1.bf16.msra.mxu0 %v1342_v26  ;;  %v509_v26 = vld [vmem:[%s2435_s1] sm:$0xff] }
  0xd5   : > { %v459_v33 = vpop.permute.xlu1 %458  ;;  %v457_v34 = vpop.permute.xlu0 %456 }
  0xd6   : > { %v461_v35 = vsel %vm460_vm3, %v457_v34, %v459_v33  ;;  %v462_v36 = vsel %vm460_vm3, %v459_v33, %v457_v34 }
  0xd7   : > { %v497_v41 = vmul.f32 %v462_v36, %v1902_v31  ;;  %v498_v42 = vmul.f32 %v461_v35, %v1904_v32  ;;  %v658_v36 = vld [vmem:[%s2438_s4] sm:$0xff] }
  0xd9   : > { %v466_v45 = vpop.permute.xlu1 %465  ;;  %v464_v46 = vpop.permute.xlu0 %463  ;;  %v1344_v47 = vpack.c.bf16 %v498_v42, %v496_v40  ;;  %v1346_v48 = vpack.c.bf16 %v497_v41, %v495_v39 }
  0xda   : > { %v468_v51 = vsel %vm467_vm4, %v464_v46, %v466_v45  ;;  %v469_v52 = vsel %vm467_vm4, %v466_v45, %v464_v46 }
  0xdb   : > { %v501_v53 = vmul.f32 %v468_v51, %v1919_v43  ;;  %v502_v54 = vmul.f32 %v469_v52, %v1921_v44  ;;  %1345 = vmatprep.subr.bf16.mxu0 %v1344_v47 }
  0xdc   : > { %1347 = vmatpush1.bf16.msra.mxu0 %v1346_v48 }
  0xdd   : > { %v473_v55 = vpop.permute.xlu1 %472  ;;  %v471_v56 = vpop.permute.xlu0 %470  ;;  %v1348_v57 = vpack.c.bf16 %v502_v54, %v500_v49  ;;  %v1350_v58 = vpack.c.bf16 %v501_v53, %v499_v50 }
  0xde   : > { %v475_v61 = vsel %vm474_vm5, %v471_v56, %v473_v55  ;;  %v476_v62 = vsel %vm474_vm5, %v473_v55, %v471_v56 }
  0xdf   : > { %1349 = vmatprep.subr.bf16.mxu0 %v1348_v57  ;;  %v503_v8 = vmul.f32 %v475_v61, %v1934_v59  ;;  %v504_v13 = vmul.f32 %v476_v62, %v1937_v60 }
  0xe0   : > { %1351 = vmatpush1.bf16.msra.mxu0 %v1350_v58 }
  0xe1   : > { %v480_v1 = vpop.permute.xlu1 %479  ;;  %v478_v3 = vpop.permute.xlu0 %477 }
  0xe2   : > { %v482_v4 = vsel %vm481_vm6, %v478_v3, %v480_v1  ;;  %v483_v7 = vsel %vm481_vm6, %v480_v1, %v478_v3 }
  0xe3   : > { %v505_v14 = vmul.f32 %v482_v4, %v1943_v63  ;;  %v506_v15 = vmul.f32 %v483_v7, %v1945_v0 }
  0xe5   : > { %v487_v17 = vpop.permute.xlu1 %486  ;;  %v485_v18 = vpop.permute.xlu0 %484  ;;  %v1352_v20 = vpack.c.bf16 %v506_v15, %v504_v13  ;;  %v1354_v21 = vpack.c.bf16 %v505_v14, %v503_v8 }
  0xe6   : > { %v489_v22 = vsel %vm488_vm7, %v485_v18, %v487_v17  ;;  %v490_v23 = vsel %vm488_vm7, %v487_v17, %v485_v18 }
  0xe7   : > { %v508_v24 = vmul.f32 %v490_v23, %v1956_v16  ;;  %1353 = vmatprep.subr.bf16.mxu0 %v1352_v20  ;;  %v507_v25 = vmul.f32 %v489_v22, %v1958_v19 }
  0xe8   : > { %1355 = vmatpush1.bf16.msra.mxu0 %v1354_v21 }
  0xe9   : > { %536 = vmatprep.subr.mxu0 %v508_v24 }
  0xec   : > { %537 = vmatpush1.msra.mxu0 %v507_v25 }
  0xed   : > { %1327 = vmatmul.mubr.msk.f32.vlgmr.msra.gmra.mrb[0].mxu0 %vm516_vm8, %v509_v26 }
  0xee   : > { %890 = vmatprep.mubr.f32.mxu0 %v1635_v2 }
  0xf6   : > { %v514_v29 = vpop.permute.xlu0 %513 }
 0x1c0   : > { %v586_v30 = vpop.f32.mrb[0].mxu0 }
 0x1c1   : > { %v1971_v33 = vadd.f32 %v586_v30, %v514_v29  ;;  %v588_v34 = vpop.f32.mrb[1].mxu0 }
 0x1c2   : > { %v1977_v35 = vadd.f32 %v588_v34, %v514_v29 }
 0x1c3   : > { %597 = vrot.lane.b32.xlu0 %v1971_v33, %s1629_s22  ;;  %591 = vrot.lane.b32.xlu1 %v1971_v33, %s1630_s19  ;;  %v647_v26 = vmul.f32 %v1971_v33, %v1913_v38 }
 0x1c4   : > { %v648_v25 = vmul.f32 %v1977_v35, %v1911_v37 }
 0x1c7   : > { %603 = vrot.lane.b32.xlu0 %v1971_v33, %s1631_s26  ;;  %593 = vrot.lane.b32.xlu1 %v1977_v35, %s1630_s19 }
 0x1cb   : > { %609 = vrot.lane.b32.xlu0 %v1971_v33, %s1632_s24  ;;  %599 = vrot.lane.b32.xlu1 %v1977_v35, %s1629_s22 }
 0x1cf   : > { %615 = vrot.lane.b32.xlu0 %v1971_v33, %s1633_s25  ;;  %605 = vrot.lane.b32.xlu1 %v1977_v35, %s1631_s26 }
 0x1d3   : > { %621 = vrot.lane.b32.xlu0 %v1971_v33, %s1634_s30  ;;  %611 = vrot.lane.b32.xlu1 %v1977_v35, %s1632_s24 }
 0x1d7   : > { %627 = vrot.lane.b32.xlu0 %v1971_v33, %s1637_s14  ;;  %617 = vrot.lane.b32.xlu1 %v1977_v35, %s1633_s25 }
 0x1db   : > { %633 = vrot.lane.b32.xlu0 %v1971_v33, %s1638_s12  ;;  %623 = vrot.lane.b32.xlu1 %v1977_v35, %s1634_s30 }
 0x1df   : > { %661 = vperm.xlu0 %1495, %v658_v36   ;;  %629 = vrot.lane.b32.xlu1 %v1977_v35, %s1637_s14 }
 0x1e3   : > { %635 = vrot.lane.b32.xlu1 %v1977_v35, %s1638_s12 }
 0x235   : > { %v598_v39 = vpop.permute.xlu0 %597  ;;  %v592_v40 = vpop.permute.xlu1 %591 }
 0x239   : > { %v604_v41 = vpop.permute.xlu0 %603  ;;  %v594_v42 = vpop.permute.xlu1 %593 }
 0x23a   : > { %v595_v45 = vsel %vm439_vm1, %v592_v40, %v594_v42  ;;  %v596_v46 = vsel %vm439_vm1, %v594_v42, %v592_v40 }
 0x23b   : > { %v639_v51 = vmul.f32 %v596_v46, %v1874_v10  ;;  %v640_v53 = vmul.f32 %v595_v45, %v1876_v11 }
 0x23d   : > { %v610_v47 = vpop.permute.xlu0 %609  ;;  %v600_v48 = vpop.permute.xlu1 %599 }
 0x23e   : > { %v601_v49 = vsel %vm446_vm0, %v598_v39, %v600_v48  ;;  %v602_v50 = vsel %vm446_vm0, %v600_v48, %v598_v39 }
 0x23f   : > { %v641_v52 = vmul.f32 %v602_v50, %v1871_v9  ;;  %v642_v54 = vmul.f32 %v601_v49, %v1878_v12 }
 0x241   : > { %v606_v55 = vpop.permute.xlu1 %605  ;;  %v1356_v56 = vpack.c.bf16 %v642_v54, %v640_v53  ;;  %v1358_v57 = vpack.c.bf16 %v641_v52, %v639_v51  ;;  %v616_v58 = vpop.permute.xlu0 %615 }
 0x242   : > { %v607_v61 = vsel %vm453_vm2, %v604_v41, %v606_v55  ;;  %v608_v62 = vsel %vm453_vm2, %v606_v55, %v604_v41 }
 0x243   : > { %1357 = vmatprep.subr.bf16.mxu1 %v1356_v56  ;;  %v643_v7 = vmul.f32 %v608_v62, %v1893_v27  ;;  %v644_v8 = vmul.f32 %v607_v61, %v1896_v28 }
 0x244   : > { %1359 = vmatpush1.bf16.msra.mxu1 %v1358_v57 }
 0x245   : > { %v612_v1 = vpop.permute.xlu1 %611  ;;  %v622_v15 = vpop.permute.xlu0 %621 }
 0x246   : > { %v613_v3 = vsel %vm460_vm3, %v610_v47, %v612_v1  ;;  %v614_v4 = vsel %vm460_vm3, %v612_v1, %v610_v47 }
 0x247   : > { %v645_v13 = vmul.f32 %v614_v4, %v1902_v31  ;;  %v646_v14 = vmul.f32 %v613_v3, %v1904_v32 }
 0x249   : > { %v618_v17 = vpop.permute.xlu1 %617  ;;  %v1360_v18 = vpack.c.bf16 %v646_v14, %v644_v8  ;;  %v1362_v20 = vpack.c.bf16 %v645_v13, %v643_v7  ;;  %v628_v36 = vpop.permute.xlu0 %627 }
 0x24a   : > { %v619_v21 = vsel %vm467_vm4, %v616_v58, %v618_v17  ;;  %v620_v22 = vsel %vm467_vm4, %v618_v17, %v616_v58  ;;  %v657_v58 = vld [vmem:[#allocation5] sm:$0xff] }
 0x24b   : > { %v649_v23 = vmul.f32 %v619_v21, %v1919_v43  ;;  %v650_v24 = vmul.f32 %v620_v22, %v1921_v44  ;;  %1361 = vmatprep.subr.bf16.mxu1 %v1360_v18 }
 0x24c   : > { %1363 = vmatpush1.bf16.msra.mxu1 %v1362_v20 }
 0x24d   : > { %v624_v29 = vpop.permute.xlu1 %623  ;;  %v1364_v30 = vpack.c.bf16 %v650_v24, %v648_v25  ;;  %v1366_v34 = vpack.c.bf16 %v649_v23, %v647_v26  ;;  %v634_v50 = vpop.permute.xlu0 %633 }
 0x24e   : > { %v625_v39 = vsel %vm474_vm5, %v622_v15, %v624_v29  ;;  %v626_v40 = vsel %vm474_vm5, %v624_v29, %v622_v15 }
 0x24f   : > { %1365 = vmatprep.subr.bf16.mxu1 %v1364_v30  ;;  %v651_v46 = vmul.f32 %v625_v39, %v1934_v59  ;;  %v652_v47 = vmul.f32 %v626_v40, %v1937_v60 }
 0x250   : > { %1367 = vmatpush1.bf16.msra.mxu1 %v1366_v34 }
 0x251   : > { %v630_v41 = vpop.permute.xlu1 %629 }
 0x252   : > { %v631_v42 = vsel %vm481_vm6, %v628_v36, %v630_v41  ;;  %v632_v45 = vsel %vm481_vm6, %v630_v41, %v628_v36 }
 0x253   : > { %v653_v48 = vmul.f32 %v631_v42, %v1943_v63  ;;  %v654_v49 = vmul.f32 %v632_v45, %v1945_v0 }
 0x255   : > { %v636_v51 = vpop.permute.xlu1 %635  ;;  %v1368_v52 = vpack.c.bf16 %v654_v49, %v652_v47  ;;  %v1370_v53 = vpack.c.bf16 %v653_v48, %v651_v46 }
 0x256   : > { %v638_v54 = vsel %vm488_vm7, %v636_v51, %v634_v50  ;;  %v637_v55 = vsel %vm488_vm7, %v634_v50, %v636_v51 }
 0x257   : > { %v656_v56 = vmul.f32 %v638_v54, %v1956_v16  ;;  %1369 = vmatprep.subr.bf16.mxu1 %v1368_v52  ;;  %v655_v57 = vmul.f32 %v637_v55, %v1958_v19 }
 0x258   : > { %1371 = vmatpush1.bf16.msra.mxu1 %v1370_v53 }
 0x259   : > { %683 = vmatprep.subr.mxu1 %v656_v56 }
 0x25c   : > { %684 = vmatpush1.msra.mxu1 %v655_v57 }
 0x25d   : > { %1328 = vmatmul.mubr.msk.f32.vlgmr.msra.gmra.mrb[0].mxu1 %vm516_vm8, %v657_v58 }
 0x25e   : > { %1108 = vmatprep.mubr.f32.mxu1 %v1635_v2  ;;  %v662_v61 = vpop.permute.xlu0 %661 }
 0x330   : > { %v733_v62 = vpop.f32.mrb[0].mxu1 }
 0x331   : > { %v734_v1 = vadd.f32 %v733_v62, %v662_v61  ;;  %v735_v3 = vpop.f32.mrb[1].mxu1 }
 0x332   : > { %v736_v4 = vadd.f32 %v735_v3, %v662_v61 }
 0x333   : > { %v2065_v7 = vadd.f32 %v734_v1, %v1971_v33  ;;  %v808_v33 = vld [vmem:[%s2440_s6] sm:$0xff] }
 0x334   : > { %v2068_v8 = vadd.f32 %v736_v4, %v1977_v35  ;;  %v809_v35 = vld [vmem:[%s2440_s6 + $0x8] sm:$0xff] }
 0x335   : > { %740 = vrot.lane.b32.xlu1 %v2065_v7, %s1630_s19  ;;  %v796_v57 = vmul.f32 %v2065_v7, %v1913_v38 }
 0x336   : > { %742 = vrot.lane.b32.xlu0 %v2068_v8, %s1630_s19  ;;  %v797_v62 = vmul.f32 %v2068_v8, %v1911_v37 }
 0x339   : > { %746 = vrot.lane.b32.xlu1 %v2065_v7, %s1629_s22 }
 0x33a   : > { %748 = vrot.lane.b32.xlu0 %v2068_v8, %s1629_s22 }
 0x33d   : > { %752 = vrot.lane.b32.xlu1 %v2065_v7, %s1631_s26 }
 0x33e   : > { %754 = vrot.lane.b32.xlu0 %v2068_v8, %s1631_s26 }
 0x341   : > { %758 = vrot.lane.b32.xlu1 %v2065_v7, %s1632_s24 }
 0x342   : > { %760 = vrot.lane.b32.xlu0 %v2068_v8, %s1632_s24 }
 0x345   : > { %764 = vrot.lane.b32.xlu1 %v2065_v7, %s1633_s25 }
 0x346   : > { %766 = vrot.lane.b32.xlu0 %v2068_v8, %s1633_s25 }
 0x349   : > { %770 = vrot.lane.b32.xlu1 %v2065_v7, %s1634_s30 }
 0x34a   : > { %772 = vrot.lane.b32.xlu0 %v2068_v8, %s1634_s30 }
 0x34d   : > { %776 = vrot.lane.b32.xlu1 %v2065_v7, %s1637_s14 }
 0x34e   : > { %778 = vrot.lane.b32.xlu0 %v2068_v8, %s1637_s14 }
 0x351   : > { %782 = vrot.lane.b32.xlu1 %v2065_v7, %s1638_s12 }
 0x352   : > { %784 = vrot.lane.b32.xlu0 %v2068_v8, %s1638_s12 }
 0x355   : > { %817 = vperm.xlu1 %1496, %v809_v35  }
 0x356   : > { %812 = vperm.xlu0 %1495, %v808_v33  }
 0x3a7   : > { %v741_v13 = vpop.permute.xlu1 %740 }
 0x3a8   : > { %v743_v14 = vpop.permute.xlu0 %742 }
 0x3a9   : > { %v744_v15 = vsel %vm439_vm1, %v741_v13, %v743_v14  ;;  %v745_v17 = vsel %vm439_vm1, %v743_v14, %v741_v13 }
 0x3aa   : > { %v788_v23 = vmul.f32 %v745_v17, %v1874_v10  ;;  %v789_v24 = vmul.f32 %v744_v15, %v1876_v11 }
 0x3ab   : > { %v747_v18 = vpop.permute.xlu1 %746 }
 0x3ac   : > { %v749_v20 = vpop.permute.xlu0 %748 }
 0x3ad   : > { %v750_v21 = vsel %vm446_vm0, %v747_v18, %v749_v20  ;;  %v751_v22 = vsel %vm446_vm0, %v749_v20, %v747_v18 }
 0x3ae   : > { %v790_v25 = vmul.f32 %v751_v22, %v1871_v9  ;;  %v791_v26 = vmul.f32 %v750_v21, %v1878_v12 }
 0x3af   : > { %v753_v29 = vpop.permute.xlu1 %752 }
 0x3b0   : > { %v1374_v30 = vpack.c.bf16 %v790_v25, %v788_v23  ;;  %v755_v34 = vpop.permute.xlu0 %754  ;;  %v1372_v36 = vpack.c.bf16 %v791_v26, %v789_v24 }
 0x3b1   : > { %v756_v39 = vsel %vm453_vm2, %v753_v29, %v755_v34  ;;  %v757_v40 = vsel %vm453_vm2, %v755_v34, %v753_v29 }
 0x3b2   : > { %1373 = vmatprep.subr.bf16.mxu0 %v1372_v36  ;;  %v792_v47 = vmul.f32 %v757_v40, %v1893_v27  ;;  %v793_v48 = vmul.f32 %v756_v39, %v1896_v28  ;;  %v806_v40 = vld [vmem:[%s2439_s5] sm:$0xff] }
 0x3b3   : > { %1375 = vmatpush1.bf16.msra.mxu0 %v1374_v30  ;;  %v759_v41 = vpop.permute.xlu1 %758 }
 0x3b4   : > { %v761_v42 = vpop.permute.xlu0 %760 }
 0x3b5   : > { %v762_v45 = vsel %vm460_vm3, %v759_v41, %v761_v42  ;;  %v763_v46 = vsel %vm460_vm3, %v761_v42, %v759_v41  ;;  %v807_v41 = vld [vmem:[%s2439_s5 + $0x8] sm:$0xff] }
 0x3b6   : > { %v794_v49 = vmul.f32 %v763_v46, %v1902_v31  ;;  %v795_v50 = vmul.f32 %v762_v45, %v1904_v32 }
 0x3b7   : > { %v765_v51 = vpop.permute.xlu1 %764 }
 0x3b8   : > { %v1378_v52 = vpack.c.bf16 %v794_v49, %v792_v47  ;;  %v767_v53 = vpop.permute.xlu0 %766  ;;  %v1376_v54 = vpack.c.bf16 %v795_v50, %v793_v48 }
 0x3b9   : > { %v768_v55 = vsel %vm467_vm4, %v765_v51, %v767_v53  ;;  %v769_v56 = vsel %vm467_vm4, %v767_v53, %v765_v51 }
 0x3ba   : > { %v798_v58 = vmul.f32 %v768_v55, %v1919_v43  ;;  %v799_v61 = vmul.f32 %v769_v56, %v1921_v44  ;;  %1377 = vmatprep.subr.bf16.mxu0 %v1376_v54 }
 0x3bb   : > { %1379 = vmatpush1.bf16.msra.mxu0 %v1378_v52  ;;  %v771_v1 = vpop.permute.xlu1 %770 }
 0x3bc   : > { %v1382_v3 = vpack.c.bf16 %v798_v58, %v796_v57  ;;  %v773_v4 = vpop.permute.xlu0 %772  ;;  %v1380_v33 = vpack.c.bf16 %v799_v61, %v797_v62 }
 0x3bd   : > { %v774_v35 = vsel %vm474_vm5, %v771_v1, %v773_v4  ;;  %v775_v13 = vsel %vm474_vm5, %v773_v4, %v771_v1 }
 0x3be   : > { %1381 = vmatprep.subr.bf16.mxu0 %v1380_v33  ;;  %v800_v20 = vmul.f32 %v774_v35, %v1934_v59  ;;  %v801_v21 = vmul.f32 %v775_v13, %v1937_v60 }
 0x3bf   : > { %v777_v14 = vpop.permute.xlu1 %776  ;;  %1383 = vmatpush1.bf16.msra.mxu0 %v1382_v3 }
 0x3c0   : > { %v779_v15 = vpop.permute.xlu0 %778 }
 0x3c1   : > { %v780_v17 = vsel %vm481_vm6, %v777_v14, %v779_v15  ;;  %v781_v18 = vsel %vm481_vm6, %v779_v15, %v777_v14 }
 0x3c2   : > { %v802_v22 = vmul.f32 %v780_v17, %v1943_v63  ;;  %v803_v23 = vmul.f32 %v781_v18, %v1945_v0 }
 0x3c3   : > { %v783_v24 = vpop.permute.xlu1 %782 }
 0x3c4   : > { %v1386_v25 = vpack.c.bf16 %v802_v22, %v800_v20  ;;  %v785_v26 = vpop.permute.xlu0 %784  ;;  %v1384_v29 = vpack.c.bf16 %v803_v23, %v801_v21 }
 0x3c5   : > { %v787_v30 = vsel %vm488_vm7, %v785_v26, %v783_v24  ;;  %v786_v34 = vsel %vm488_vm7, %v783_v24, %v785_v26 }
 0x3c6   : > { %v805_v36 = vmul.f32 %v787_v30, %v1956_v16  ;;  %1385 = vmatprep.subr.bf16.mxu0 %v1384_v29  ;;  %v804_v39 = vmul.f32 %v786_v34, %v1958_v19 }
 0x3c7   : > { %1387 = vmatpush1.bf16.msra.mxu0 %v1386_v25 }
 0x3c8   : > { %842 = vmatprep.subr.mxu0 %v805_v36 }
 0x3cb   : > { %843 = vmatpush1.msra.mxu0 %v804_v39 }
 0x3cc   : > { %1329 = vmatmul.mubr.msk.f32.vlgmr.msra.gmra.mrb[2].mxu0 %vm516_vm8, %v806_v40 }
 0x3cd   : > { %896 = vmatprep.mubr.f32.mxu0 %v1635_v2 }
 0x3d0   : > { %1330 = vmatmul.mubr.msk.f32.gmra.mrb[4].mxu0 %vm516_vm8, %v807_v41 }
 0x3d4   : > { %v818_v53 = vpop.permute.xlu1 %817 }
 0x3d5   : > { %v813_v42 = vpop.permute.xlu0 %812 }
 0x49f   : > { %v892_v45 = vpop.f32.mrb[2].mxu0 }
 0x4a0   : > { %v893_v46 = vadd.f32 %v892_v45, %v813_v42  ;;  %v894_v47 = vpop.f32.mrb[3].mxu0 }
 0x4a1   : > { %v895_v48 = vadd.f32 %v894_v47, %v813_v42 }
 0x4a2   : > { %v2170_v49 = vadd.f32 %v893_v46, %v2065_v7 }
 0x4a3   : > { %v2173_v50 = vadd.f32 %v895_v48, %v2068_v8  ;;  %v898_v51 = vpop.f32.mrb[4].mxu0 }
 0x4a4   : > { %v900_v52 = vpop.f32.mrb[5].mxu0  ;;  %907 = vrot.lane.b32.xlu1 %v2170_v49, %s1630_s19  ;;  %v899_v54 = vadd.f32 %v898_v51, %v818_v53 }
 0x4a5   : > { %909 = vrot.lane.b32.xlu0 %v2173_v50, %s1630_s19  ;;  %v901_v55 = vadd.f32 %v900_v52, %v818_v53 }
 0x4a6   : > { %v2188_v56 = vadd.f32 %v899_v54, %v2065_v7  ;;  %v1189_v7 = vld [vmem:[%s2443_s9] sm:$0xff] }
 0x4a7   : > { %v2191_v57 = vadd.f32 %v901_v55, %v2068_v8 }
 0x4a8   : > { %913 = vrot.lane.b32.xlu1 %v2170_v49, %s1629_s22 }
 0x4a9   : > { %915 = vrot.lane.b32.xlu0 %v2173_v50, %s1629_s22 }
 0x4ac   : > { %919 = vrot.lane.b32.xlu1 %v2170_v49, %s1631_s26 }
 0x4ad   : > { %921 = vrot.lane.b32.xlu0 %v2173_v50, %s1631_s26 }
 0x4b0   : > { %974 = vrot.lane.b32.xlu1 %v2188_v56, %s1630_s19 }
 0x4b1   : > { %976 = vrot.lane.b32.xlu0 %v2191_v57, %s1630_s19  ;;  %s1557_s19 = sshll.u32 %s1640_s21, 4  ;;  %s1558_s19 = int_to_ptr.vmem [resolvable:$false] %s1557_s19 }
 0x4b4   : > { %980 = vrot.lane.b32.xlu1 %v2188_v56, %s1629_s22 }
 0x4b5   : > { %982 = vrot.lane.b32.xlu0 %v2191_v57, %s1629_s22 }
 0x4b8   : > { %986 = vrot.lane.b32.xlu1 %v2188_v56, %s1631_s26 }
 0x4b9   : > { %988 = vrot.lane.b32.xlu0 %v2191_v57, %s1631_s26  ;;  %s1559_s26 = scalar_lea.vmem %s1558_s19, 64 }
 0x4bc   : > { %992 = vrot.lane.b32.xlu1 %v2188_v56, %s1632_s24 }
 0x4bd   : > { %994 = vrot.lane.b32.xlu0 %v2191_v57, %s1632_s24 }
 0x4c0   : > { %998 = vrot.lane.b32.xlu1 %v2188_v56, %s1633_s25 }
 0x4c1   : > { %1000 = vrot.lane.b32.xlu0 %v2191_v57, %s1633_s25 }
 0x4c4   : > { %1004 = vrot.lane.b32.xlu1 %v2188_v56, %s1634_s30 }
 0x4c5   : > { %1006 = vrot.lane.b32.xlu0 %v2191_v57, %s1634_s30 }
 0x4c8   : > { %1010 = vrot.lane.b32.xlu1 %v2188_v56, %s1637_s14 }
 0x4c9   : > { %1012 = vrot.lane.b32.xlu0 %v2191_v57, %s1637_s14 }
 0x4cc   : > { %925 = vrot.lane.b32.xlu1 %v2170_v49, %s1632_s24 }
 0x4cd   : > { %927 = vrot.lane.b32.xlu0 %v2173_v50, %s1632_s24 }
 0x4d0   : > { %1016 = vrot.lane.b32.xlu1 %v2188_v56, %s1638_s12 }
 0x4d1   : > { %1018 = vrot.lane.b32.xlu0 %v2191_v57, %s1638_s12 }
 0x4d4   : > { %931 = vrot.lane.b32.xlu1 %v2170_v49, %s1633_s25 }
 0x4d5   : > { %933 = vrot.lane.b32.xlu0 %v2173_v50, %s1633_s25 }
 0x4d8   : > { %937 = vrot.lane.b32.xlu1 %v2170_v49, %s1634_s30 }
 0x4d9   : > { %939 = vrot.lane.b32.xlu0 %v2173_v50, %s1634_s30 }
 0x4dc   : > { %943 = vrot.lane.b32.xlu1 %v2170_v49, %s1637_s14 }
 0x4dd   : > { %945 = vrot.lane.b32.xlu0 %v2173_v50, %s1637_s14  ;;  %s405_s14 = sand.u32 1, %s1615_s18  }
 0x4de   : > { %s1221_s16 = scalar_lea.sflag [#allocation4], %s405_s14 }
 0x4e0   : > { %949 = vrot.lane.b32.xlu1 %v2170_v49, %s1638_s12 }
 0x4e1   : > { %951 = vrot.lane.b32.xlu0 %v2173_v50, %s1638_s12  ;;  %s1324_s12 = sshll.u32 %s405_s14, 1 }
 0x4e2   : > { %s407_s23 = scalar_lea.vmem [#allocation7], %s1324_s12 }
 0x4e3   : > { %s1235_s28 = sshll.u32 %s407_s23, 4  ;;  %s2394_s28 = int_to_ptr.vmem [resolvable:$true] %s1235_s28 }
 0x4e4   : > { %1192 = vperm.xlu1 %1496, %v1189_v7   ;;  %v1030_v7 = vmul.f32 %v2188_v56, %v1913_v38  ;;  %s1553_s22 = scalar_lea.vmem %s2394_s28, 32  ;;  %p1560_p4 = scmp.lt.s32.totalorder %s2394_s28, %s1558_s19 }
 0x4e5   : > { %p1554_p12 = scmp.ne.s32.totalorder %s2394_s28, %s1553_s22  ;;  %p1561_p7 = scmp.lt.s32.totalorder %s1559_s26, %s1553_s22 }
 0x4e7   : > { %p1555_p2 = pnand %p1554_p12, %p2468_p1  ;;  %p1562_p8 = por %p1561_p7, %p1560_p4 }
 0x4e9   : > { %p1556_p3 = pneg %p1555_p2 }
 0x4eb   : > { %p1563_p11 = pnand %p1562_p8, %p1556_p3 }
 0x516   : > { %v2248_v8 = vpop.permute.xlu1 %907 }
 0x517   : > { %v2250_v58 = vpop.permute.xlu0 %909 }
 0x51a   : > { %v2252_v61 = vpop.permute.xlu1 %913 }
 0x51b   : > { %v2254_v62 = vpop.permute.xlu0 %915 }
 0x51e   : > { %v2256_v1 = vpop.permute.xlu1 %919 }
 0x51f   : > { %v2258_v3 = vpop.permute.xlu0 %921 }
 0x522   : > { %v975_v4 = vpop.permute.xlu1 %974 }
 0x523   : > { %v977_v33 = vpop.permute.xlu0 %976 }
 0x524   : > { %v978_v35 = vsel %vm439_vm1, %v975_v4, %v977_v33  ;;  %v979_v13 = vsel %vm439_vm1, %v977_v33, %v975_v4 }
 0x525   : > { %v1022_v20 = vmul.f32 %v979_v13, %v1874_v10  ;;  %v1023_v21 = vmul.f32 %v978_v35, %v1876_v11  ;;  %v1031_v35 = vmul.f32 %v2191_v57, %v1911_v37 }
 0x526   : > { %v981_v14 = vpop.permute.xlu1 %980 }
 0x527   : > { %v983_v15 = vpop.permute.xlu0 %982 }
 0x528   : > { %v984_v17 = vsel %vm446_vm0, %v981_v14, %v983_v15  ;;  %v985_v18 = vsel %vm446_vm0, %v983_v15, %v981_v14 }
 0x529   : > { %v1024_v22 = vmul.f32 %v985_v18, %v1871_v9  ;;  %v1025_v23 = vmul.f32 %v984_v17, %v1878_v12 }
 0x52a   : > { %v987_v24 = vpop.permute.xlu1 %986 }
 0x52b   : > { %v1390_v25 = vpack.c.bf16 %v1024_v22, %v1022_v20  ;;  %v989_v26 = vpop.permute.xlu0 %988  ;;  %v1388_v29 = vpack.c.bf16 %v1025_v23, %v1023_v21 }
 0x52c   : > { %v990_v30 = vsel %vm453_vm2, %v987_v24, %v989_v26  ;;  %v991_v34 = vsel %vm453_vm2, %v989_v26, %v987_v24 }
 0x52d   : > { %1389 = vmatprep.subr.bf16.mxu1 %v1388_v29  ;;  %v1026_v42 = vmul.f32 %v991_v34, %v1893_v27  ;;  %v1027_v45 = vmul.f32 %v990_v30, %v1896_v28 }
 0x52e   : > { %1391 = vmatpush1.bf16.msra.mxu1 %v1390_v25  ;;  %v993_v36 = vpop.permute.xlu1 %992 }
 0x52f   : > { %v995_v39 = vpop.permute.xlu0 %994 }
 0x530   : > { %v996_v40 = vsel %vm460_vm3, %v993_v36, %v995_v39  ;;  %v997_v41 = vsel %vm460_vm3, %v995_v39, %v993_v36  ;;  %v911_v39 = vsel %vm439_vm1, %v2248_v8, %v2250_v58 }
 0x531   : > { %v1028_v46 = vmul.f32 %v997_v41, %v1902_v31  ;;  %v1029_v47 = vmul.f32 %v996_v40, %v1904_v32  ;;  %v917_v40 = vsel %vm446_vm0, %v2252_v61, %v2254_v62  ;;  %v918_v41 = vsel %vm446_vm0, %v2254_v62, %v2252_v61 }
 0x532   : > { %v999_v48 = vpop.permute.xlu1 %998  ;;  %v923_v61 = vsel %vm453_vm2, %v2256_v1, %v2258_v3 }
 0x533   : > { %v1394_v51 = vpack.c.bf16 %v1028_v46, %v1026_v42  ;;  %v1001_v52 = vpop.permute.xlu0 %1000  ;;  %v1392_v53 = vpack.c.bf16 %v1029_v47, %v1027_v45  ;;  %v912_v46 = vsel %vm439_vm1, %v2250_v58, %v2248_v8  ;;  %v956_v47 = vmul.f32 %v911_v39, %v1876_v11 }
 0x534   : > { %v1002_v54 = vsel %vm467_vm4, %v999_v48, %v1001_v52  ;;  %v1003_v55 = vsel %vm467_vm4, %v1001_v52, %v999_v48  ;;  %v958_v48 = vmul.f32 %v917_v40, %v1878_v12  ;;  %v957_v52 = vmul.f32 %v918_v41, %v1871_v9 }
 0x535   : > { %v1032_v4 = vmul.f32 %v1002_v54, %v1919_v43  ;;  %v1033_v33 = vmul.f32 %v1003_v55, %v1921_v44  ;;  %1393 = vmatprep.subr.bf16.mxu1 %v1392_v53  ;;  %v955_v58 = vmul.f32 %v912_v46, %v1874_v10  ;;  %v1040_v55 = vld [vmem:[%s2442_s8] sm:$0xff]  ;;  %v1204_v39 = vshrl.u32 %v437_v5, 7 }
 0x536   : > { %1395 = vmatpush1.bf16.msra.mxu1 %v1394_v51  ;;  %v1005_v13 = vpop.permute.xlu1 %1004 }
 0x537   : > { %v1398_v14 = vpack.c.bf16 %v1032_v4, %v1030_v7  ;;  %v1007_v15 = vpop.permute.xlu0 %1006  ;;  %v1396_v17 = vpack.c.bf16 %v1033_v33, %v1031_v35  ;;  %v924_v7 = vsel %vm453_vm2, %v2258_v3, %v2256_v1  ;;  %v960_v4 = vmul.f32 %v923_v61, %v1896_v28 }
 0x538   : > { %v1008_v18 = vsel %vm474_vm5, %v1005_v13, %v1007_v15  ;;  %v1009_v56 = vsel %vm474_vm5, %v1007_v15, %v1005_v13  ;;  %v1406_v35 = vpack.c.bf16 %v957_v52, %v955_v58  ;;  %v959_v28 = vmul.f32 %v924_v7, %v1893_v27 }
 0x539   : > { %1397 = vmatprep.subr.bf16.mxu1 %v1396_v17  ;;  %v1034_v23 = vmul.f32 %v1008_v18, %v1934_v59  ;;  %v1035_v24 = vmul.f32 %v1009_v56, %v1937_v60  ;;  %v964_v17 = vmul.f32 %v2173_v50, %v1911_v37 }
 0x53a   : > { %1399 = vmatpush1.bf16.msra.mxu1 %v1398_v14  ;;  %v1011_v20 = vpop.permute.xlu1 %1010 }
 0x53b   : > { %v1013_v21 = vpop.permute.xlu0 %1012 }
 0x53c   : > { %v1014_v22 = vsel %vm481_vm6, %v1011_v20, %v1013_v21  ;;  %v1015_v57 = vsel %vm481_vm6, %v1013_v21, %v1011_v20 }
 0x53d   : > { %v1036_v25 = vmul.f32 %v1014_v22, %v1943_v63  ;;  %v1037_v26 = vmul.f32 %v1015_v57, %v1945_v0 }
 0x53e   : > { %v926_v29 = vpop.permute.xlu1 %925 }
 0x53f   : > { %v1402_v30 = vpack.c.bf16 %v1036_v25, %v1034_v23  ;;  %v928_v34 = vpop.permute.xlu0 %927  ;;  %v1400_v36 = vpack.c.bf16 %v1037_v26, %v1035_v24 }
 0x540   : > { %v929_v42 = vsel %vm460_vm3, %v926_v29, %v928_v34  ;;  %v930_v8 = vsel %vm460_vm3, %v928_v34, %v926_v29 }
 0x541   : > { %1401 = vmatprep.subr.bf16.mxu1 %v1400_v36  ;;  %v962_v11 = vmul.f32 %v929_v42, %v1904_v32  ;;  %v1404_v32 = vpack.c.bf16 %v958_v48, %v956_v47  ;;  %v961_v13 = vmul.f32 %v930_v8, %v1902_v31 }
 0x542   : > { %1403 = vmatpush1.bf16.msra.mxu1 %v1402_v30  ;;  %v1017_v45 = vpop.permute.xlu1 %1016 }
 0x543   : > { %v1019_v51 = vpop.permute.xlu0 %1018  ;;  %v1408_v1 = vpack.c.bf16 %v962_v11, %v960_v4  ;;  %v1410_v18 = vpack.c.bf16 %v961_v13, %v959_v28 }
 0x544   : > { %v1020_v62 = vsel %vm488_vm7, %v1017_v45, %v1019_v51  ;;  %v1021_v53 = vsel %vm488_vm7, %v1019_v51, %v1017_v45 }
 0x545   : > { %v1038_v12 = vmul.f32 %v1020_v62, %v1958_v19  ;;  %v1039_v9 = vmul.f32 %v1021_v53, %v1956_v16 }
 0x546   : > { %v932_v54 = vpop.permute.xlu1 %931 }
 0x547   : > { %v934_v33 = vpop.permute.xlu0 %933  ;;  %1060 = vmatprep.subr.mxu1 %v1039_v9 }
 0x548   : > { %v936_v10 = vsel %vm467_vm4, %v934_v33, %v932_v54  ;;  %1061 = vmatpush1.msra.mxu1 %v1038_v12  ;;  %v935_v14 = vsel %vm467_vm4, %v932_v54, %v934_v33 }
 0x549   : > { %v966_v15 = vmul.f32 %v936_v10, %v1921_v44  ;;  %1405 = vmatprep.subr.bf16.mxu1 %v1404_v32  ;;  %1331 = vmatmul.mubr.msk.f32.vlgmr.msra.gmra.mrb[2].mxu1 %vm516_vm8, %v1040_v55  ;;  %v965_v56 = vmul.f32 %v935_v14, %v1919_v43  ;;  %v963_v44 = vmul.f32 %v2170_v49, %v1913_v38 }
 0x54a   : > { %1407 = vmatpush1.bf16.msra.mxu1 %v1406_v35  ;;  %v938_v3 = vpop.permute.xlu1 %937  ;;  %1182 = vmatprep.mubr.f32.mxu1 %v1635_v2 }
 0x54b   : > { %v940_v31 = vpop.permute.xlu0 %939  ;;  %1409 = vmatprep.subr.bf16.mxu1 %v1408_v1  ;;  %v1412_v20 = vpack.c.bf16 %v966_v15, %v964_v17  ;;  %v1414_v57 = vpack.c.bf16 %v965_v56, %v963_v44 }
 0x54c   : > { %v941_v21 = vsel %vm474_vm5, %v938_v3, %v940_v31  ;;  %v942_v27 = vsel %vm474_vm5, %v940_v31, %v938_v3 }
 0x54d   : > { %v967_v50 = vmul.f32 %v941_v21, %v1934_v59  ;;  %v968_v38 = vmul.f32 %v942_v27, %v1937_v60 }
 0x54e   : > { %1411 = vmatpush1.bf16.msra.mxu1 %v1410_v18  ;;  %v944_v2 = vpop.permute.xlu1 %943 }
 0x54f   : > { %v946_v22 = vpop.permute.xlu0 %945  ;;  %1413 = vmatprep.subr.bf16.mxu1 %v1412_v20 }
 0x550   : > { %v947_v37 = vsel %vm481_vm6, %v944_v2, %v946_v22  ;;  %v948_v43 = vsel %vm481_vm6, %v946_v22, %v944_v2 }
 0x551   : > { %v969_v49 = vmul.f32 %v947_v37, %v1943_v63  ;;  %v970_v23 = vmul.f32 %v948_v43, %v1945_v0  ;;  %v973_v63 = vld [vmem:[%s2441_s7] sm:$0xff]  ;;  %v1639_v0 = vmov 1966171168  }
 0x552   : > { %v950_v24 = vpop.permute.xlu1 %949  ;;  %1415 = vmatpush1.bf16.msra.mxu1 %v1414_v57  ;;  %v1201_v36 = vunpack.c.l.s4 %v1639_v0 }
 0x553   : > { %v1418_v25 = vpack.c.bf16 %v969_v49, %v967_v50  ;;  %v952_v26 = vpop.permute.xlu0 %951  ;;  %v1416_v29 = vpack.c.bf16 %v970_v23, %v968_v38 }
 0x554   : > { %v954_v30 = vsel %vm488_vm7, %v952_v26, %v950_v24  ;;  %v953_v34 = vsel %vm488_vm7, %v950_v24, %v952_v26  ;;  %v1202_v6 = vunpack.c.0.s8 %v1201_v36 }
 0x555   : > { %v972_v59 = vmul.f32 %v954_v30, %v1956_v16  ;;  %1417 = vmatprep.subr.bf16.mxu1 %v1416_v29  ;;  %v971_v60 = vmul.f32 %v953_v34, %v1958_v19 }
 0x556   : > { %1419 = vmatpush1.bf16.msra.mxu1 %v1418_v25  ;;  %v1205_v45 = vsub.s32 %v1202_v6, %v1204_v39 }
 0x557   : > { %1134 = vmatprep.subr.mxu1 %v972_v59 }
 0x55a   : > { %1135 = vmatpush1.msra.mxu1 %v971_v60 }
 0x55b   : > { %1332 = vmatmul.mubr.msk.f32.vlgmr.msra.gmra.mrb[2].mxu1 %vm516_vm8, %v973_v63 }
 0x563   : > { %v1193_v16 = vpop.permute.xlu1 %1192 }
 0x62e   : > { %v1184_v40 = vpop.f32.mrb[2].mxu1 }
 0x62f   : > { %v1195_v41 = vadd.f32 %v1193_v16, %v1184_v40  ;;  %v1186_v42 = vpop.f32.mrb[3].mxu1 }
 0x630   : > { %v1196_v19 = vadd.f32 %v1193_v16, %v1186_v42 }
 0x632   : > { %v1199_v46 = vcombine.low %v1195_v41, %v1196_v19 }
 0x634   : > { %v1206_v47 = vrot.slane %v1199_v46, %v1205_v45 }
 0x636   : > { %v1213_v48 = vrot.slane %v1206_v47, %v1205_v45 }
 0x638   : > { %1219 = vst.msk [vmem:[%s407_s23] sm:$0x3] %vm1217_vm9, %v1213_v48 }
 0x639   : > { %1566 = shalt.err (!%p1563_p11)
}
 0x63a   : > { %s1567_s24 = scalar_lea.hbm %s2392_s29, 32  ;;  %s1571_s14 = scalar_lea.hbm %s2445_s11, 64 }
 0x63b   : > { %p1568_p13 = scmp.ne.s32.totalorder %s2392_s29, %s1567_s24  ;;  %p1572_p6 = scmp.lt.u32.totalorder %s2392_s29, %s2445_s11 }
 0x63c   : > { %p1573_p9 = scmp.lt.u32.totalorder %s1571_s14, %s1567_s24  ;;  %p1575_p12 = scmp.lt.u32.totalorder %s1567_s24, %s2392_s29 }
 0x63d   : > { %p1569_p5 = pnand %p1568_p13, %p2468_p1 }
 0x63e   : > { %p1574_p10 = por %p1573_p9, %p1572_p6 }
 0x63f   : > { %p1570_p0 = pneg %p1569_p5 }
 0x640   : > { %p1576_p2 = por %p1575_p12, %p1574_p10 }
 0x642   : > { %p1577_p3 = pnand %p1576_p2, %p1570_p0 }
 0x644   : > { %1580 = shalt.err (!%p1577_p3)
}
 0x645   : > { %1430 = dma.vmem_to_hbm [thread:$0]  (%p2468_p1), %s2394_s28, 32, %s2392_s29, %s1221_s16  }
 0x646 PF: > { %s2469_s23 = sld [smem:[#allocation11_spill]]  ;;  %s2470_s13 = sld [smem:[#allocation15_spill]] }
 0x647   : > { %p1447_p4 = scmp.ge.s32.totalorder %s1623_s20, 2 }
 0x64c   : > { %s1247_s15 = sand.u32 1, %s2469_s23   ;;  %p2471_p7 = scmp.ne.s32.totalorder %s2470_s13, 0 }
 0x64d   : > { %s1248_s22 = scalar_lea.sflag [#allocation4], %s1247_s15 }
 0x64e   : > { %p1440_p8 = pnand %p1447_p4, %p2471_p7 }
 0x650   : > { %1606 = dma.done.wait (!%p1440_p8), %s1248_s22, 32  }
 0x651   : > { %1608 = vsyncadd (!%p1440_p8), %s1248_s22, 4294967264  ;;  %s2472_s20 = sld [smem:[#allocation13_spill]]  ;;  %s2473_s21 = sld [smem:[#allocation12_spill]] }
 0x652   : > { %s2474_s19 = sld [smem:[#allocation14_spill]]  ;;  %s2475_s17 = smov %s1615_s18 }
 0x657   : > { %p23_p11 = scmp.ge.s32.totalorder %s2472_s20, 4   ;;  %s2476_s18 = smov %s2473_s21 }
 0x659   :  { %25 = sbr.rel (!%p23_p11) target bundleno = 5 (0x5), region = 108 }
 0x660   :  { %1253 = vsyncpa [#allocation3], 1 }
 0x661   :  { %1255 = vsyncpa [#allocation3 + $0x1], 1 }
 0x662   :  { %1256 = vsyncpa [#allocation6], 1 }
 0x663   :  { %1257 = vsyncpa [#allocation4], 1 }
 0x664   :  { %1259 = vsyncpa [#allocation4 + $0x1], 1 }

</bundles_post_ra>
